<compile_context>
chip_gen: v7x
topology: tpu7x:2x2x1
jax: 0.10.0
libtpu: 0.0.40
codegen_flags: <defaults>
</compile_context>

<pallas_src>
import functools

import jax
import jax.numpy as jnp
from jax.experimental import pallas as pl
from jax.experimental.pallas import tpu as pltpu


def _round_up(x, m):
    return ((x + m - 1) // m) * m


def dqn_mlp_kernel(x_ref,
                   w1_ref, b1_ref,
                   w2_ref, b2_ref,
                   w3_ref, b3_ref,
                   w4_ref, b4_ref,
                   w5_ref, b5_ref,
                   w6_ref, b6_ref,
                   out_ref,
                   *, sub_rows):
    """One batch block of the DQN MLP, processed in `sub_rows`-row sub-tiles.

    x_ref:   (B_BLK, n_obs)      bf16
    w*_ref:  (in, out)           bf16  (VMEM resident across the whole grid)
    b*_ref:  (1, out)            f32
    out_ref: (B_BLK, n_actions)  f32
    """
    hidden_layers = ((w1_ref, b1_ref), (w2_ref, b2_ref), (w3_ref, b3_ref),
                     (w4_ref, b4_ref), (w5_ref, b5_ref))
    n_sub = out_ref.shape[0] // sub_rows

    for t in range(n_sub):                      # static -> straight-line code
        lo, hi = t * sub_rows, (t + 1) * sub_rows
        h = x_ref[lo:hi, :]                                    # bf16 operand
        for w_ref, b_ref in hidden_layers:
            acc = jnp.dot(h, w_ref[...],
                          preferred_element_type=jnp.float32)  # MXU, f32 acc
            # bias add in f32, cast to bf16, ReLU in bf16 (identical result to
            # f32 ReLU + cast; half the epilogue VALU work on v6e/v7x).
            h = jnp.maximum((acc + b_ref[...]).astype(jnp.bfloat16), 0.0)
        acc = jnp.dot(h, w6_ref[...], preferred_element_type=jnp.float32)
        out_ref[lo:hi, :] = acc + b6_ref[...]                  # layer6: no ReLU


def prepare_params(params):
    """One-time conversion of f32 master params to the kernel layout/dtypes:
    bf16 weights (in, out), f32 biases (1, out). Call once, outside the
    per-step forward path."""
    prepared = {}
    for i in range(1, 7):
        prepared[f"w{i}"] = jnp.asarray(params[f"w{i}"], jnp.bfloat16)
        prepared[f"b{i}"] = jnp.asarray(params[f"b{i}"], jnp.float32).reshape(1, -1)
    return prepared


def dqn_forward(x, prepared, *, block_batch=512, sub_rows=256):
    """Batch-tiled forward pass of the 6-layer DQN MLP.

    x:           (batch, n_observations) f32
    prepared:    output of prepare_params()
    block_batch: rows per grid step (amortizes per-grid-step overhead)
    sub_rows:    rows per in-kernel sub-tile (bounds live accumulator vregs)
    """
    batch, n_obs = x.shape
    n_actions = prepared["w6"].shape[1]

    # bf16 packs 16 rows per vreg -> keep row blocks multiples of 16.
    sub = _round_up(min(sub_rows, block_batch, max(batch, 1)), 16)
    b_blk = _round_up(min(block_batch, max(batch, 1)), 16)
    b_blk = _round_up(b_blk, sub)             # sub-tiles evenly divide a block
    batch_pad = _round_up(batch, b_blk)
    num_blocks = batch_pad // b_blk

    x_bf = x.astype(jnp.bfloat16)             # halves the input DMA bytes
    if batch_pad != batch:
        x_bf = jnp.pad(x_bf, ((0, batch_pad - batch), (0, 0)))

    args = (x_bf,
            prepared["w1"], prepared["b1"],
            prepared["w2"], prepared["b2"],
            prepared["w3"], prepared["b3"],
            prepared["w4"], prepared["b4"],
            prepared["w5"], prepared["b5"],
            prepared["w6"], prepared["b6"])

    resident = lambda i: (0, 0)               # weights/biases: fetched once
    in_specs = [pl.BlockSpec((b_blk, n_obs), lambda i: (i, 0))]
    in_specs += [pl.BlockSpec(a.shape, resident) for a in args[1:]]

    out_padded = pl.pallas_call(
        functools.partial(dqn_mlp_kernel, sub_rows=sub),
        out_shape=jax.ShapeDtypeStruct((batch_pad, n_actions), jnp.float32),
        grid=(num_blocks,),
        in_specs=in_specs,
        out_specs=pl.BlockSpec((b_blk, n_actions), lambda i: (i, 0)),
        compiler_params=pltpu.CompilerParams(
            dimension_semantics=("parallel",),   # v7x: both TCs split batch
        ),
    )(*args)

    return out_padded[:batch] if batch_pad != batch else out_padded


def init_params(key, n_observations, n_actions, nodes_per_layer=128):
    """Deterministic synthetic init matching nn.Linear fan-in init.

    PyTorch stores Linear weight as (out, in); here we directly materialize
    the transposed (in, out) layout used by the kernel.
    """
    dims = [n_observations] + [nodes_per_layer] * 5 + [n_actions]
    params = {}
    keys = jax.random.split(key, 6)
    for i in range(6):
        fan_in, fan_out = dims[i], dims[i + 1]
        bound = 1.0 / jnp.sqrt(fan_in)
        wkey, bkey = jax.random.split(keys[i])
        params[f"w{i+1}"] = jax.random.uniform(
            wkey, (fan_in, fan_out), jnp.float32, -bound, bound)
        params[f"b{i+1}"] = jax.random.uniform(
            bkey, (1, fan_out), jnp.float32, -bound, bound)
    return params


def reference_forward(x, params):
    """Pure-JAX reference with the same numerics as the kernel:
    bf16 matmul operands, f32 accumulation, f32 bias-add, ReLU."""
    h = x
    for i in range(1, 7):
        w = params[f"w{i}"].astype(jnp.bfloat16)
        h = jnp.dot(h.astype(jnp.bfloat16), w,
                    preferred_element_type=jnp.float32) + params[f"b{i}"]
        if i < 6:
            h = jnp.maximum(h, 0.0)
    return h


if __name__ == "__main__":
    key = jax.random.PRNGKey(0)
    k_x, k_p = jax.random.split(key)

    batch = 64             # small test batch
    n_observations = 16    # native width, no padding
    n_actions = 4          # native width, no padding
    nodes_per_layer = 128

    x = jax.random.normal(k_x, (batch, n_observations), jnp.float32)
    params = init_params(k_p, n_observations, n_actions, nodes_per_layer)
    prepared = prepare_params(params)   # one-time cast, outside forward path

    # block_batch=32, sub_rows=16 -> grid of 2 batch blocks (exercises the
    # pipelined grid + megacore split) with 2 in-kernel sub-tiles per block
    # (exercises the sub-tiled path) while keeping the test shapes small.
    # Production use: block_batch=512-1024, sub_rows=256.
    out = dqn_forward(x, prepared, block_batch=32, sub_rows=16)
    out = jax.block_until_ready(out)

    ref = reference_forward(x, params)
    assert out.shape == (batch, n_actions), out.shape
    err = float(jnp.max(jnp.abs(out - ref)))
    assert jnp.allclose(out, ref, atol=1e-3, rtol=1e-3), err

    print("KERNEL_OK")
</pallas_src>

<mosaic_0001>
module attributes {stable_mosaic.version = 11 : i64} {
  func.func @dqn_mlp_kernel(%arg0: i32, %arg1: memref<32x16xbf16, #tpu.memory_space<vmem>>, %arg2: memref<16x128xbf16, #tpu.memory_space<vmem>>, %arg3: memref<1x128xf32, #tpu.memory_space<vmem>>, %arg4: memref<128x128xbf16, #tpu.memory_space<vmem>>, %arg5: memref<1x128xf32, #tpu.memory_space<vmem>>, %arg6: memref<128x128xbf16, #tpu.memory_space<vmem>>, %arg7: memref<1x128xf32, #tpu.memory_space<vmem>>, %arg8: memref<128x128xbf16, #tpu.memory_space<vmem>>, %arg9: memref<1x128xf32, #tpu.memory_space<vmem>>, %arg10: memref<128x128xbf16, #tpu.memory_space<vmem>>, %arg11: memref<1x128xf32, #tpu.memory_space<vmem>>, %arg12: memref<128x4xbf16, #tpu.memory_space<vmem>>, %arg13: memref<1x4xf32, #tpu.memory_space<vmem>>, %arg14: memref<32x4xf32, #tpu.memory_space<vmem>>) attributes {dimension_semantics = [#tpu.dimension_semantics<parallel>], iteration_bounds = array<i64: 2>, scalar_prefetch = 0 : i64, scratch_operands = 0 : i64, tpu.core_type = #tpu.core_type<tc>, window_params = [{transform_indices = @transform_0, window_bounds = array<i64: 32, 16>}, {pipeline_mode = #tpu.pipeline_mode<synchronous>, transform_indices = @transform_1, window_bounds = array<i64: 16, 128>}, {pipeline_mode = #tpu.pipeline_mode<synchronous>, transform_indices = @transform_2, window_bounds = array<i64: 1, 128>}, {pipeline_mode = #tpu.pipeline_mode<synchronous>, transform_indices = @transform_3, window_bounds = array<i64: 128, 128>}, {pipeline_mode = #tpu.pipeline_mode<synchronous>, transform_indices = @transform_4, window_bounds = array<i64: 1, 128>}, {pipeline_mode = #tpu.pipeline_mode<synchronous>, transform_indices = @transform_5, window_bounds = array<i64: 128, 128>}, {pipeline_mode = #tpu.pipeline_mode<synchronous>, transform_indices = @transform_6, window_bounds = array<i64: 1, 128>}, {pipeline_mode = #tpu.pipeline_mode<synchronous>, transform_indices = @transform_7, window_bounds = array<i64: 128, 128>}, {pipeline_mode = #tpu.pipeline_mode<synchronous>, transform_indices = @transform_8, window_bounds = array<i64: 1, 128>}, {pipeline_mode = #tpu.pipeline_mode<synchronous>, transform_indices = @transform_9, window_bounds = array<i64: 128, 128>}, {pipeline_mode = #tpu.pipeline_mode<synchronous>, transform_indices = @transform_10, window_bounds = array<i64: 1, 128>}, {pipeline_mode = #tpu.pipeline_mode<synchronous>, transform_indices = @transform_11, window_bounds = array<i64: 128, 4>}, {pipeline_mode = #tpu.pipeline_mode<synchronous>, transform_indices = @transform_12, window_bounds = array<i64: 1, 4>}, {transform_indices = @transform_13, window_bounds = array<i64: 32, 4>}]} {
    %c0 = arith.constant 0 : index
    %c0_0 = arith.constant 0 : index
    %0 = vector.load %arg1[%c0, %c0_0] : memref<32x16xbf16, #tpu.memory_space<vmem>>, vector<16x16xbf16>
    %c0_1 = arith.constant 0 : index
    %c0_2 = arith.constant 0 : index
    %1 = vector.load %arg2[%c0_1, %c0_2] : memref<16x128xbf16, #tpu.memory_space<vmem>>, vector<16x128xbf16>
    %cst = arith.constant dense<0.000000e+00> : vector<16x128xf32>
    %2 = tpu.matmul %0, %1, %cst {dimension_numbers = #tpu.dot_dimension_numbers<[1], [0], [0], [1], [0, 0, 1, 1], [], []>} : vector<16x16xbf16>, vector<16x128xbf16>, vector<16x128xf32> -> vector<16x128xf32>
    %c0_3 = arith.constant 0 : index
    %c0_4 = arith.constant 0 : index
    %3 = vector.load %arg3[%c0_3, %c0_4] : memref<1x128xf32, #tpu.memory_space<vmem>>, vector<1x128xf32>
    %4 = vector.broadcast %3 : vector<1x128xf32> to vector<16x128xf32>
    %5 = arith.addf %2, %4 : vector<16x128xf32>
    %6 = arith.truncf %5 : vector<16x128xf32> to vector<16x128xbf16>
    %cst_5 = arith.constant 0.000000e+00 : bf16
    %7 = vector.broadcast %cst_5 : bf16 to vector<16x128xbf16>
    %8 = arith.maximumf %6, %7 : vector<16x128xbf16>
    %c0_6 = arith.constant 0 : index
    %c0_7 = arith.constant 0 : index
    %9 = vector.load %arg4[%c0_6, %c0_7] : memref<128x128xbf16, #tpu.memory_space<vmem>>, vector<128x128xbf16>
    %cst_8 = arith.constant dense<0.000000e+00> : vector<16x128xf32>
    %10 = tpu.matmul %8, %9, %cst_8 {dimension_numbers = #tpu.dot_dimension_numbers<[1], [0], [0], [1], [0, 0, 1, 1], [], []>} : vector<16x128xbf16>, vector<128x128xbf16>, vector<16x128xf32> -> vector<16x128xf32>
    %c0_9 = arith.constant 0 : index
    %c0_10 = arith.constant 0 : index
    %11 = vector.load %arg5[%c0_9, %c0_10] : memref<1x128xf32, #tpu.memory_space<vmem>>, vector<1x128xf32>
    %12 = vector.broadcast %11 : vector<1x128xf32> to vector<16x128xf32>
    %13 = arith.addf %10, %12 : vector<16x128xf32>
    %14 = arith.truncf %13 : vector<16x128xf32> to vector<16x128xbf16>
    %cst_11 = arith.constant 0.000000e+00 : bf16
    %15 = vector.broadcast %cst_11 : bf16 to vector<16x128xbf16>
    %16 = arith.maximumf %14, %15 : vector<16x128xbf16>
    %c0_12 = arith.constant 0 : index
    %c0_13 = arith.constant 0 : index
    %17 = vector.load %arg6[%c0_12, %c0_13] : memref<128x128xbf16, #tpu.memory_space<vmem>>, vector<128x128xbf16>
    %cst_14 = arith.constant dense<0.000000e+00> : vector<16x128xf32>
    %18 = tpu.matmul %16, %17, %cst_14 {dimension_numbers = #tpu.dot_dimension_numbers<[1], [0], [0], [1], [0, 0, 1, 1], [], []>} : vector<16x128xbf16>, vector<128x128xbf16>, vector<16x128xf32> -> vector<16x128xf32>
    %c0_15 = arith.constant 0 : index
    %c0_16 = arith.constant 0 : index
    %19 = vector.load %arg7[%c0_15, %c0_16] : memref<1x128xf32, #tpu.memory_space<vmem>>, vector<1x128xf32>
    %20 = vector.broadcast %19 : vector<1x128xf32> to vector<16x128xf32>
    %21 = arith.addf %18, %20 : vector<16x128xf32>
    %22 = arith.truncf %21 : vector<16x128xf32> to vector<16x128xbf16>
    %cst_17 = arith.constant 0.000000e+00 : bf16
    %23 = vector.broadcast %cst_17 : bf16 to vector<16x128xbf16>
    %24 = arith.maximumf %22, %23 : vector<16x128xbf16>
    %c0_18 = arith.constant 0 : index
    %c0_19 = arith.constant 0 : index
    %25 = vector.load %arg8[%c0_18, %c0_19] : memref<128x128xbf16, #tpu.memory_space<vmem>>, vector<128x128xbf16>
    %cst_20 = arith.constant dense<0.000000e+00> : vector<16x128xf32>
    %26 = tpu.matmul %24, %25, %cst_20 {dimension_numbers = #tpu.dot_dimension_numbers<[1], [0], [0], [1], [0, 0, 1, 1], [], []>} : vector<16x128xbf16>, vector<128x128xbf16>, vector<16x128xf32> -> vector<16x128xf32>
    %c0_21 = arith.constant 0 : index
    %c0_22 = arith.constant 0 : index
    %27 = vector.load %arg9[%c0_21, %c0_22] : memref<1x128xf32, #tpu.memory_space<vmem>>, vector<1x128xf32>
    %28 = vector.broadcast %27 : vector<1x128xf32> to vector<16x128xf32>
    %29 = arith.addf %26, %28 : vector<16x128xf32>
    %30 = arith.truncf %29 : vector<16x128xf32> to vector<16x128xbf16>
    %cst_23 = arith.constant 0.000000e+00 : bf16
    %31 = vector.broadcast %cst_23 : bf16 to vector<16x128xbf16>
    %32 = arith.maximumf %30, %31 : vector<16x128xbf16>
    %c0_24 = arith.constant 0 : index
    %c0_25 = arith.constant 0 : index
    %33 = vector.load %arg10[%c0_24, %c0_25] : memref<128x128xbf16, #tpu.memory_space<vmem>>, vector<128x128xbf16>
    %cst_26 = arith.constant dense<0.000000e+00> : vector<16x128xf32>
    %34 = tpu.matmul %32, %33, %cst_26 {dimension_numbers = #tpu.dot_dimension_numbers<[1], [0], [0], [1], [0, 0, 1, 1], [], []>} : vector<16x128xbf16>, vector<128x128xbf16>, vector<16x128xf32> -> vector<16x128xf32>
    %c0_27 = arith.constant 0 : index
    %c0_28 = arith.constant 0 : index
    %35 = vector.load %arg11[%c0_27, %c0_28] : memref<1x128xf32, #tpu.memory_space<vmem>>, vector<1x128xf32>
    %36 = vector.broadcast %35 : vector<1x128xf32> to vector<16x128xf32>
    %37 = arith.addf %34, %36 : vector<16x128xf32>
    %38 = arith.truncf %37 : vector<16x128xf32> to vector<16x128xbf16>
    %cst_29 = arith.constant 0.000000e+00 : bf16
    %39 = vector.broadcast %cst_29 : bf16 to vector<16x128xbf16>
    %40 = arith.maximumf %38, %39 : vector<16x128xbf16>
    %c0_30 = arith.constant 0 : index
    %c0_31 = arith.constant 0 : index
    %41 = vector.load %arg12[%c0_30, %c0_31] : memref<128x4xbf16, #tpu.memory_space<vmem>>, vector<128x4xbf16>
    %cst_32 = arith.constant dense<0.000000e+00> : vector<16x4xf32>
    %42 = tpu.matmul %40, %41, %cst_32 {dimension_numbers = #tpu.dot_dimension_numbers<[1], [0], [0], [1], [0, 0, 1, 1], [], []>} : vector<16x128xbf16>, vector<128x4xbf16>, vector<16x4xf32> -> vector<16x4xf32>
    %c0_33 = arith.constant 0 : index
    %c0_34 = arith.constant 0 : index
    %43 = vector.load %arg13[%c0_33, %c0_34] : memref<1x4xf32, #tpu.memory_space<vmem>>, vector<1x4xf32>
    %44 = vector.broadcast %43 : vector<1x4xf32> to vector<16x4xf32>
    %45 = arith.addf %42, %44 : vector<16x4xf32>
    %c0_35 = arith.constant 0 : index
    %c0_36 = arith.constant 0 : index
    %46 = vector.load %arg14[%c0_35, %c0_36] : memref<32x4xf32, #tpu.memory_space<vmem>>, vector<16x4xf32>
    tpu.vector_store %arg14[%c0_35, %c0_36], %45 {strides = array<i32>} : memref<32x4xf32, #tpu.memory_space<vmem>>, vector<16x4xf32>,
    %c16 = arith.constant 16 : index
    %c0_37 = arith.constant 0 : index
    %47 = vector.load %arg1[%c16, %c0_37] : memref<32x16xbf16, #tpu.memory_space<vmem>>, vector<16x16xbf16>
    %c0_38 = arith.constant 0 : index
    %c0_39 = arith.constant 0 : index
    %48 = vector.load %arg2[%c0_38, %c0_39] : memref<16x128xbf16, #tpu.memory_space<vmem>>, vector<16x128xbf16>
    %cst_40 = arith.constant dense<0.000000e+00> : vector<16x128xf32>
    %49 = tpu.matmul %47, %48, %cst_40 {dimension_numbers = #tpu.dot_dimension_numbers<[1], [0], [0], [1], [0, 0, 1, 1], [], []>} : vector<16x16xbf16>, vector<16x128xbf16>, vector<16x128xf32> -> vector<16x128xf32>
    %c0_41 = arith.constant 0 : index
    %c0_42 = arith.constant 0 : index
    %50 = vector.load %arg3[%c0_41, %c0_42] : memref<1x128xf32, #tpu.memory_space<vmem>>, vector<1x128xf32>
    %51 = vector.broadcast %50 : vector<1x128xf32> to vector<16x128xf32>
    %52 = arith.addf %49, %51 : vector<16x128xf32>
    %53 = arith.truncf %52 : vector<16x128xf32> to vector<16x128xbf16>
    %cst_43 = arith.constant 0.000000e+00 : bf16
    %54 = vector.broadcast %cst_43 : bf16 to vector<16x128xbf16>
    %55 = arith.maximumf %53, %54 : vector<16x128xbf16>
    %c0_44 = arith.constant 0 : index
    %c0_45 = arith.constant 0 : index
    %56 = vector.load %arg4[%c0_44, %c0_45] : memref<128x128xbf16, #tpu.memory_space<vmem>>, vector<128x128xbf16>
    %cst_46 = arith.constant dense<0.000000e+00> : vector<16x128xf32>
    %57 = tpu.matmul %55, %56, %cst_46 {dimension_numbers = #tpu.dot_dimension_numbers<[1], [0], [0], [1], [0, 0, 1, 1], [], []>} : vector<16x128xbf16>, vector<128x128xbf16>, vector<16x128xf32> -> vector<16x128xf32>
    %c0_47 = arith.constant 0 : index
    %c0_48 = arith.constant 0 : index
    %58 = vector.load %arg5[%c0_47, %c0_48] : memref<1x128xf32, #tpu.memory_space<vmem>>, vector<1x128xf32>
    %59 = vector.broadcast %58 : vector<1x128xf32> to vector<16x128xf32>
    %60 = arith.addf %57, %59 : vector<16x128xf32>
    %61 = arith.truncf %60 : vector<16x128xf32> to vector<16x128xbf16>
    %cst_49 = arith.constant 0.000000e+00 : bf16
    %62 = vector.broadcast %cst_49 : bf16 to vector<16x128xbf16>
    %63 = arith.maximumf %61, %62 : vector<16x128xbf16>
    %c0_50 = arith.constant 0 : index
    %c0_51 = arith.constant 0 : index
    %64 = vector.load %arg6[%c0_50, %c0_51] : memref<128x128xbf16, #tpu.memory_space<vmem>>, vector<128x128xbf16>
    %cst_52 = arith.constant dense<0.000000e+00> : vector<16x128xf32>
    %65 = tpu.matmul %63, %64, %cst_52 {dimension_numbers = #tpu.dot_dimension_numbers<[1], [0], [0], [1], [0, 0, 1, 1], [], []>} : vector<16x128xbf16>, vector<128x128xbf16>, vector<16x128xf32> -> vector<16x128xf32>
    %c0_53 = arith.constant 0 : index
    %c0_54 = arith.constant 0 : index
    %66 = vector.load %arg7[%c0_53, %c0_54] : memref<1x128xf32, #tpu.memory_space<vmem>>, vector<1x128xf32>
    %67 = vector.broadcast %66 : vector<1x128xf32> to vector<16x128xf32>
    %68 = arith.addf %65, %67 : vector<16x128xf32>
    %69 = arith.truncf %68 : vector<16x128xf32> to vector<16x128xbf16>
    %cst_55 = arith.constant 0.000000e+00 : bf16
    %70 = vector.broadcast %cst_55 : bf16 to vector<16x128xbf16>
    %71 = arith.maximumf %69, %70 : vector<16x128xbf16>
    %c0_56 = arith.constant 0 : index
    %c0_57 = arith.constant 0 : index
    %72 = vector.load %arg8[%c0_56, %c0_57] : memref<128x128xbf16, #tpu.memory_space<vmem>>, vector<128x128xbf16>
    %cst_58 = arith.constant dense<0.000000e+00> : vector<16x128xf32>
    %73 = tpu.matmul %71, %72, %cst_58 {dimension_numbers = #tpu.dot_dimension_numbers<[1], [0], [0], [1], [0, 0, 1, 1], [], []>} : vector<16x128xbf16>, vector<128x128xbf16>, vector<16x128xf32> -> vector<16x128xf32>
    %c0_59 = arith.constant 0 : index
    %c0_60 = arith.constant 0 : index
    %74 = vector.load %arg9[%c0_59, %c0_60] : memref<1x128xf32, #tpu.memory_space<vmem>>, vector<1x128xf32>
    %75 = vector.broadcast %74 : vector<1x128xf32> to vector<16x128xf32>
    %76 = arith.addf %73, %75 : vector<16x128xf32>
    %77 = arith.truncf %76 : vector<16x128xf32> to vector<16x128xbf16>
    %cst_61 = arith.constant 0.000000e+00 : bf16
    %78 = vector.broadcast %cst_61 : bf16 to vector<16x128xbf16>
    %79 = arith.maximumf %77, %78 : vector<16x128xbf16>
    %c0_62 = arith.constant 0 : index
    %c0_63 = arith.constant 0 : index
    %80 = vector.load %arg10[%c0_62, %c0_63] : memref<128x128xbf16, #tpu.memory_space<vmem>>, vector<128x128xbf16>
    %cst_64 = arith.constant dense<0.000000e+00> : vector<16x128xf32>
    %81 = tpu.matmul %79, %80, %cst_64 {dimension_numbers = #tpu.dot_dimension_numbers<[1], [0], [0], [1], [0, 0, 1, 1], [], []>} : vector<16x128xbf16>, vector<128x128xbf16>, vector<16x128xf32> -> vector<16x128xf32>
    %c0_65 = arith.constant 0 : index
    %c0_66 = arith.constant 0 : index
    %82 = vector.load %arg11[%c0_65, %c0_66] : memref<1x128xf32, #tpu.memory_space<vmem>>, vector<1x128xf32>
    %83 = vector.broadcast %82 : vector<1x128xf32> to vector<16x128xf32>
    %84 = arith.addf %81, %83 : vector<16x128xf32>
    %85 = arith.truncf %84 : vector<16x128xf32> to vector<16x128xbf16>
    %cst_67 = arith.constant 0.000000e+00 : bf16
    %86 = vector.broadcast %cst_67 : bf16 to vector<16x128xbf16>
    %87 = arith.maximumf %85, %86 : vector<16x128xbf16>
    %c0_68 = arith.constant 0 : index
    %c0_69 = arith.constant 0 : index
    %88 = vector.load %arg12[%c0_68, %c0_69] : memref<128x4xbf16, #tpu.memory_space<vmem>>, vector<128x4xbf16>
    %cst_70 = arith.constant dense<0.000000e+00> : vector<16x4xf32>
    %89 = tpu.matmul %87, %88, %cst_70 {dimension_numbers = #tpu.dot_dimension_numbers<[1], [0], [0], [1], [0, 0, 1, 1], [], []>} : vector<16x128xbf16>, vector<128x4xbf16>, vector<16x4xf32> -> vector<16x4xf32>
    %c0_71 = arith.constant 0 : index
    %c0_72 = arith.constant 0 : index
    %90 = vector.load %arg13[%c0_71, %c0_72] : memref<1x4xf32, #tpu.memory_space<vmem>>, vector<1x4xf32>
    %91 = vector.broadcast %90 : vector<1x4xf32> to vector<16x4xf32>
    %92 = arith.addf %89, %91 : vector<16x4xf32>
    %c16_73 = arith.constant 16 : index
    %c0_74 = arith.constant 0 : index
    %93 = vector.load %arg14[%c16_73, %c0_74] : memref<32x4xf32, #tpu.memory_space<vmem>>, vector<16x4xf32>
    tpu.vector_store %arg14[%c16_73, %c0_74], %92 {strides = array<i32>} : memref<32x4xf32, #tpu.memory_space<vmem>>, vector<16x4xf32>,
    return
  }
  func.func @transform_0(%arg0: i32) -> (i32, i32) {
    %c0_i32 = arith.constant 0 : i32
    %c0_i32_0 = arith.constant 0 : i32
    return %arg0, %c0_i32 : i32, i32
  }
  func.func @transform_1(%arg0: i32) -> (i32, i32) {
    %c0_i32 = arith.constant 0 : i32
    %c0_i32_0 = arith.constant 0 : i32
    %c0_i32_1 = arith.constant 0 : i32
    return %c0_i32, %c0_i32_0 : i32, i32
  }
  func.func @transform_2(%arg0: i32) -> (i32, i32) {
    %c0_i32 = arith.constant 0 : i32
    %c0_i32_0 = arith.constant 0 : i32
    %c0_i32_1 = arith.constant 0 : i32
    return %c0_i32, %c0_i32_0 : i32, i32
  }
  func.func @transform_3(%arg0: i32) -> (i32, i32) {
    %c0_i32 = arith.constant 0 : i32
    %c0_i32_0 = arith.constant 0 : i32
    %c0_i32_1 = arith.constant 0 : i32
    return %c0_i32, %c0_i32_0 : i32, i32
  }
  func.func @transform_4(%arg0: i32) -> (i32, i32) {
    %c0_i32 = arith.constant 0 : i32
    %c0_i32_0 = arith.constant 0 : i32
    %c0_i32_1 = arith.constant 0 : i32
    return %c0_i32, %c0_i32_0 : i32, i32
  }
  func.func @transform_5(%arg0: i32) -> (i32, i32) {
    %c0_i32 = arith.constant 0 : i32
    %c0_i32_0 = arith.constant 0 : i32
    %c0_i32_1 = arith.constant 0 : i32
    return %c0_i32, %c0_i32_0 : i32, i32
  }
  func.func @transform_6(%arg0: i32) -> (i32, i32) {
    %c0_i32 = arith.constant 0 : i32
    %c0_i32_0 = arith.constant 0 : i32
    %c0_i32_1 = arith.constant 0 : i32
    return %c0_i32, %c0_i32_0 : i32, i32
  }
  func.func @transform_7(%arg0: i32) -> (i32, i32) {
    %c0_i32 = arith.constant 0 : i32
    %c0_i32_0 = arith.constant 0 : i32
    %c0_i32_1 = arith.constant 0 : i32
    return %c0_i32, %c0_i32_0 : i32, i32
  }
  func.func @transform_8(%arg0: i32) -> (i32, i32) {
    %c0_i32 = arith.constant 0 : i32
    %c0_i32_0 = arith.constant 0 : i32
    %c0_i32_1 = arith.constant 0 : i32
    return %c0_i32, %c0_i32_0 : i32, i32
  }
  func.func @transform_9(%arg0: i32) -> (i32, i32) {
    %c0_i32 = arith.constant 0 : i32
    %c0_i32_0 = arith.constant 0 : i32
    %c0_i32_1 = arith.constant 0 : i32
    return %c0_i32, %c0_i32_0 : i32, i32
  }
  func.func @transform_10(%arg0: i32) -> (i32, i32) {
    %c0_i32 = arith.constant 0 : i32
    %c0_i32_0 = arith.constant 0 : i32
    %c0_i32_1 = arith.constant 0 : i32
    return %c0_i32, %c0_i32_0 : i32, i32
  }
  func.func @transform_11(%arg0: i32) -> (i32, i32) {
    %c0_i32 = arith.constant 0 : i32
    %c0_i32_0 = arith.constant 0 : i32
    %c0_i32_1 = arith.constant 0 : i32
    return %c0_i32, %c0_i32_0 : i32, i32
  }
  func.func @transform_12(%arg0: i32) -> (i32, i32) {
    %c0_i32 = arith.constant 0 : i32
    %c0_i32_0 = arith.constant 0 : i32
    %c0_i32_1 = arith.constant 0 : i32
    return %c0_i32, %c0_i32_0 : i32, i32
  }
  func.func @transform_13(%arg0: i32) -> (i32, i32) {
    %c0_i32 = arith.constant 0 : i32
    %c0_i32_0 = arith.constant 0 : i32
    return %arg0, %c0_i32 : i32, i32
  }
}

</mosaic_0001>

<bundles_post_ra>
// kernel: tpu_custom_call.1
= control target key start
LH: loop header
LB: loop body
LE: loop exit
PB: predicated region body
PF: predicated region fallthrough
CT: control target
= control target key end

     0   :  { %s3307_s0 = inlined_call_operand.vmem [shape: bf16[64,16], index: 0, kind: input, shape index: {}]   ;;  %s3308_s1 = inlined_call_operand.hbm [shape: bf16[16,128], index: 1, kind: input, shape index: {}]   ;;  %s3309_s2 = inlined_call_operand.hbm [shape: f32[1,128], index: 2, kind: input, shape index: {}]   ;;  %s3310_s3 = inlined_call_operand.vmem [shape: bf16[128,128], index: 3, kind: input, shape index: {}]   ;;  %s3311_s4 = inlined_call_operand.hbm [shape: f32[1,128], index: 4, kind: input, shape index: {}]   ;;  %s3312_s5 = inlined_call_operand.hbm [shape: bf16[128,128], index: 5, kind: input, shape index: {}]   ;;  %s3313_s6 = inlined_call_operand.hbm [shape: f32[1,128], index: 6, kind: input, shape index: {}]   ;;  %s3314_s7 = inlined_call_operand.vmem [shape: bf16[128,128], index: 7, kind: input, shape index: {}]   ;;  %s3315_s8 = inlined_call_operand.vmem [shape: f32[1,128], index: 8, kind: input, shape index: {}]   ;;  %s3316_s9 = inlined_call_operand.hbm [shape: bf16[128,128], index: 9, kind: input, shape index: {}]   ;;  %s3317_s10 = inlined_call_operand.vmem [shape: f32[1,128], index: 10, kind: input, shape index: {}]   ;;  %s3318_s11 = inlined_call_operand.vmem [shape: bf16[128,4], index: 11, kind: input, shape index: {}]   ;;  %s3319_s12 = inlined_call_operand.vmem [shape: f32[1,4], index: 12, kind: input, shape index: {}]   ;;  %s3320_s13 = inlined_call_operand.vmem [shape: f32[64,4], index: 13, kind: output, shape index: {}]  }
   0x1   :  { %3326 = sst [smem:[#allocation16_spill]] %s3309_s2 }
   0x2   :  { %3327 = sst [smem:[#allocation17_spill]] %s3320_s13 }
   0x3   :  { %18 = vsyncpa [#allocation3], 0 }
   0x4   :  { %19 = vsyncpa [#allocation5], 0 }
   0x5   :  { %20 = vsyncpa [#allocation8], 0 }
   0x6   :  { %21 = vsyncpa [#allocation11], 0  ;;  %s2779_s25 = smov 0  }
   0x7 LB: > { %s2698_s26 = smov [#allocation4]   ;;  %s3321_s28 = sadd.s32 4294967295, %s2696_s25   ;;  %s2696_s25 = sphi %s2779_s25, %s27_s25  }
   0x8   : > { %s362_s27 = sshll.u32 %s2698_s26, 4  ;;  %p1923_p0 = scmp.ge.s32.totalorder %s2696_s25, 1  ;;  %s2793_s27 = int_to_ptr.vmem [resolvable:$true] %s362_s27 }
   0x9   : > { %p336_p1 = scmp.lt.s32.totalorder %s2696_s25, 3  ;;  %p2789_p2 = scmp.eq.s32.totalorder %s3321_s28, 0 }
   0xa   : > { %s2699_s14 = smov [#allocation7]   ;;  %s2700_s17 = smov [#allocation2]  }
   0xb   : > { %s3328_s29 = scalar_select %p2789_p2, 1, 0 }
   0xc   : > { %p2795_p3 = pnand %p1923_p0, %p336_p1  ;;  %s386_s15 = sshll.u32 %s2699_s14, 4  ;;  %s2801_s15 = int_to_ptr.vmem [resolvable:$true] %s386_s15 }
   0xd   : > { %s348_s18 = sshll.u32 %s2700_s17, 4  ;;  %s2701_s19 = smov [#allocation6]   ;;  %s2809_s18 = int_to_ptr.vmem [resolvable:$true] %s348_s18 }
   0xe   : > { %s3329_s30 = scalar_select %p2795_p3, 1, 0 }
   0xf   : > { %p2372_p4 = pneg %p2795_p3  ;;  %s2811_s20 = sshll.u32 %s2701_s19, 4  ;;  %s377_s20 = int_to_ptr.vmem [resolvable:$true] %s2811_s20 }
  0x10   : > { %s3331_s2 = sld [smem:[#allocation16_spill]] }
  0x11   : > { %p2805_p5 = pnand %p2789_p2, %p2372_p4 }
  0x13   : > { %p2821_p7 = pneg %p2805_p5 }
  0x16   : > { %s2506_s23 = scalar_lea.hbm %s3331_s2, 16 }
  0x17   : > { %p2507_p6 = scmp.ne.s32.totalorder %s3331_s2, %s2506_s23  ;;  %p2513_p10 = scmp.lt.u32.totalorder %s2506_s23, %s3331_s2 }
  0x19   : > { %p2509_p8 = pnand %p2821_p7, %p2507_p6 }
  0x1b   : > { %p2510_p9 = pneg %p2509_p8 }
  0x1d   : > { %p2515_p11 = pnand %p2513_p10, %p2510_p9 }
  0x1f   : > { %2518 = shalt.err (!%p2515_p11)
}
  0x20   : > { %s2519_s21 = scalar_lea.vmem %s2793_s27, 16  ;;  %s2526_s22 = scalar_lea.vmem %s2793_s27, 32 }
  0x21   : > { %p2520_p12 = scmp.ne.s32.totalorder %s2793_s27, %s2519_s21  ;;  %p2527_p1 = scmp.lt.s32.totalorder %s2793_s27, %s2793_s27 }
  0x22   : > { %p2528_p4 = scmp.lt.s32.totalorder %s2526_s22, %s2519_s21 }
  0x23   : > { %p2522_p13 = pnand %p2520_p12, %p2821_p7 }
  0x24   : > { %p2529_p6 = por %p2528_p4, %p2527_p1 }
  0x25   : > { %p2523_p0 = pneg %p2522_p13 }
  0x27   : > { %p2530_p8 = pnand %p2529_p6, %p2523_p0 }
  0x29   : > { %2533 = shalt.err (!%p2530_p8)
}
  0x2a   : > { %2378 = dma.hbm_to_vmem [thread:$0]  (!%p2805_p5), %s3331_s2, 16, %s2793_s27, [#allocation5]  }
  0x2b   : > { %s2534_s19 = scalar_lea.hbm %s3312_s5, 1024 }
  0x2c   : > { %p2535_p9 = scmp.ne.s32.totalorder %s3312_s5, %s2534_s19  ;;  %p2541_p12 = scmp.lt.u32.totalorder %s2534_s19, %s3312_s5 }
  0x2e   : > { %p2537_p10 = pnand %p2535_p9, %p2821_p7 }
  0x30   : > { %p2538_p11 = pneg %p2537_p10 }
  0x32   : > { %p2543_p13 = pnand %p2541_p12, %p2538_p11 }
  0x34   : > { %2546 = shalt.err (!%p2543_p13)
}
  0x35   : > { %s2547_s27 = scalar_lea.vmem %s2801_s15, 1024  ;;  %p2555_p6 = scmp.lt.s32.totalorder %s2801_s15, %s2801_s15 }
  0x36   : > { %p2548_p0 = scmp.ne.s32.totalorder %s2801_s15, %s2547_s27  ;;  %p2556_p8 = scmp.lt.s32.totalorder %s2547_s27, %s2547_s27 }
  0x38   : > { %p2550_p1 = pnand %p2548_p0, %p2821_p7  ;;  %p2557_p9 = por %p2556_p8, %p2555_p6 }
  0x3a   : > { %p2551_p4 = pneg %p2550_p1 }
  0x3c   : > { %p2558_p10 = pnand %p2557_p9, %p2551_p4 }
  0x3e   : > { %2561 = shalt.err (!%p2558_p10)
}
  0x3f   : > { %s3325_s13 = smov 64   ;;  %s2703_s28 = smov 4  }
  0x40   : > { %2384 = dma.hbm_to_vmem [thread:$0]  (!%p2805_p5), %s3312_s5, 1024, %s2801_s15, [#allocation8], %s3325_s13, %s3325_s13, %s2703_s28  }
  0x41   : > { %s2562_s19 = scalar_lea.hbm %s3308_s1, 128 }
  0x42   : > { %p2563_p11 = scmp.ne.s32.totalorder %s3308_s1, %s2562_s19  ;;  %p2569_p0 = scmp.lt.u32.totalorder %s2562_s19, %s3308_s1 }
  0x44   : > { %p2565_p12 = pnand %p2563_p11, %p2821_p7 }
  0x46   : > { %p2566_p13 = pneg %p2565_p12 }
  0x48   : > { %p2571_p1 = pnand %p2569_p0, %p2566_p13 }
  0x4a   : > { %2574 = shalt.err (!%p2571_p1)
}
  0x4b   : > { %s2575_s15 = scalar_lea.vmem %s2809_s18, 128  ;;  %p2583_p9 = scmp.lt.s32.totalorder %s2809_s18, %s2809_s18 }
  0x4c   : > { %p2576_p4 = scmp.ne.s32.totalorder %s2809_s18, %s2575_s15  ;;  %p2584_p10 = scmp.lt.s32.totalorder %s2575_s15, %s2575_s15 }
  0x4e   : > { %p2578_p6 = pnand %p2576_p4, %p2821_p7  ;;  %p2585_p11 = por %p2584_p10, %p2583_p9 }
  0x50   : > { %p2579_p8 = pneg %p2578_p6 }
  0x52   : > { %p2586_p12 = pnand %p2585_p11, %p2579_p8 }
  0x54   : > { %2589 = shalt.err (!%p2586_p12)
}
  0x55   : > { %2375 = dma.hbm_to_vmem [thread:$0]  (!%p2805_p5), %s3308_s1, 128, %s2809_s18, [#allocation3], %s3325_s13, %s3325_s13, %s2703_s28  }
  0x56   : > { %s2590_s17 = scalar_lea.hbm %s3311_s4, 16 }
  0x57   : > { %p2591_p13 = scmp.ne.s32.totalorder %s3311_s4, %s2590_s17  ;;  %p2597_p4 = scmp.lt.u32.totalorder %s2590_s17, %s3311_s4 }
  0x59   : > { %p2593_p0 = pnand %p2591_p13, %p2821_p7 }
  0x5b   : > { %p2594_p1 = pneg %p2593_p0 }
  0x5d   : > { %p2599_p6 = pnand %p2597_p4, %p2594_p1 }
  0x5f   : > { %2602 = shalt.err (!%p2599_p6)
}
  0x60   : > { %s2603_s15 = scalar_lea.vmem %s377_s20, 16  ;;  %s2610_s18 = scalar_lea.vmem %s377_s20, 32 }
  0x61   : > { %p2604_p8 = scmp.ne.s32.totalorder %s377_s20, %s2603_s15  ;;  %p2611_p11 = scmp.lt.s32.totalorder %s377_s20, %s377_s20 }
  0x62   : > { %p2612_p12 = scmp.lt.s32.totalorder %s2610_s18, %s2603_s15 }
  0x63   : > { %p2606_p9 = pnand %p2604_p8, %p2821_p7 }
  0x64   : > { %p2613_p2 = por %p2612_p12, %p2611_p11 }
  0x65   : > { %p2607_p10 = pneg %p2606_p9 }
  0x67   : > { %p2614_p3 = pnand %p2613_p2, %p2607_p10 }
  0x69   : > { %2617 = shalt.err (!%p2614_p3)
}
  0x6a   : > { %2381 = dma.hbm_to_vmem [thread:$0]  (!%p2805_p5), %s3311_s4, 16, %s377_s20, [#allocation5]  }
  0x6b   : > { %s2704_s24 = smov [#allocation9]   ;;  %s2705_s17 = smov [#allocation10]  }
  0x6c   : > { %s400_s26 = sshll.u32 %s2704_s24, 4  ;;  %s416_s19 = sshll.u32 %s2705_s17, 4  ;;  %s401_s26 = int_to_ptr.vmem [resolvable:$true] %s400_s26  ;;  %s417_s19 = int_to_ptr.vmem [resolvable:$true] %s416_s19 }
  0x6d   : > { %s2618_s27 = scalar_lea.hbm %s3313_s6, 16 }
  0x6e   : > { %p2619_p2 = scmp.ne.s32.totalorder %s3313_s6, %s2618_s27  ;;  %p2625_p0 = scmp.lt.u32.totalorder %s2618_s27, %s3313_s6 }
  0x70   : > { %p2621_p3 = pnand %p2619_p2, %p2821_p7 }
  0x72   : > { %p2622_p13 = pneg %p2621_p3 }
  0x74   : > { %p2627_p1 = pnand %p2625_p0, %p2622_p13 }
  0x76   : > { %2630 = shalt.err (!%p2627_p1)
}
  0x77   : > { %s2631_s20 = scalar_lea.vmem %s401_s26, 16  ;;  %s2638_s23 = scalar_lea.vmem %s401_s26, 32 }
  0x78   : > { %p2632_p4 = scmp.ne.s32.totalorder %s401_s26, %s2631_s20  ;;  %p2639_p9 = scmp.lt.s32.totalorder %s401_s26, %s401_s26 }
  0x79   : > { %p2640_p10 = scmp.lt.s32.totalorder %s2638_s23, %s2631_s20 }
  0x7a   : > { %p2634_p6 = pnand %p2632_p4, %p2821_p7 }
  0x7b   : > { %p2641_p11 = por %p2640_p10, %p2639_p9 }
  0x7c   : > { %p2635_p8 = pneg %p2634_p6 }
  0x7e   : > { %p2642_p12 = pnand %p2641_p11, %p2635_p8 }
  0x80   : > { %2645 = shalt.err (!%p2642_p12)
}
  0x81   : > { %2387 = dma.hbm_to_vmem [thread:$0]  (!%p2805_p5), %s3313_s6, 16, %s401_s26, [#allocation8]  }
  0x82   : > { %s2646_s22 = scalar_lea.hbm %s3316_s9, 1024 }
  0x83   : > { %p2647_p2 = scmp.ne.s32.totalorder %s3316_s9, %s2646_s22  ;;  %p2653_p0 = scmp.lt.u32.totalorder %s2646_s22, %s3316_s9 }
  0x85   : > { %p2649_p3 = pnand %p2647_p2, %p2821_p7 }
  0x87   : > { %p2650_p13 = pneg %p2649_p3 }
  0x89   : > { %p2655_p1 = pnand %p2653_p0, %p2650_p13 }
  0x8b   : > { %2658 = shalt.err (!%p2655_p1)
}
  0x8c   : > { %s2659_s20 = scalar_lea.vmem %s417_s19, 1024  ;;  %p2667_p9 = scmp.lt.s32.totalorder %s417_s19, %s417_s19 }
  0x8d   : > { %p2660_p4 = scmp.ne.s32.totalorder %s417_s19, %s2659_s20  ;;  %p2668_p10 = scmp.lt.s32.totalorder %s2659_s20, %s2659_s20 }
  0x8f   : > { %p2662_p6 = pnand %p2660_p4, %p2821_p7  ;;  %p2669_p11 = por %p2668_p10, %p2667_p9 }
  0x91   : > { %p2663_p8 = pneg %p2662_p6 }
  0x93   : > { %p2670_p12 = pnand %p2669_p11, %p2663_p8 }
  0x95   : > { %2673 = shalt.err (!%p2670_p12)
}
  0x96   : > { %s3333_s26 = smov 64   ;;  %p3334_p2 = scmp.ne.s32.totalorder %s3329_s30, 0 }
  0x97   : > { %2390 = dma.hbm_to_vmem [thread:$0]  (!%p2805_p5), %s3316_s9, 1024, %s417_s19, [#allocation11], %s3333_s26, %s3333_s26, %s2703_s28  }
  0x98   : > { %450 = sbr.rel (%p3334_p2) target bundleno = 2379 (0x94b), region = 72  ;;  %p3335_p7 = scmp.ne.s32.totalorder (!%p3334_p2), %s3328_s29, 0 }
  0x9f   : > { %2679 = dma.done.wait (%p3335_p7), [#allocation3], 128  }
  0xa0   : > { %2681 = vsyncadd (%p3335_p7), [#allocation3], 4294967168 }
  0xa1   : > { %2683 = dma.done.wait (%p3335_p7), [#allocation5], 32  }
  0xa2   : > { %2685 = vsyncadd (%p3335_p7), [#allocation5], 4294967264 }
  0xa3   : > { %2687 = dma.done.wait (%p3335_p7), [#allocation8], 1040  }
  0xa4   : > { %2689 = vsyncadd (%p3335_p7), [#allocation8], 4294966256 }
  0xa5   : > { %2691 = dma.done.wait (%p3335_p7), [#allocation11], 1024  }
  0xa6   : > { %2693 = vsyncadd (%p3335_p7), [#allocation11], 4294966272  ;;  %s3336_s30 = sadd.s32 4294967295, %s2696_s25   ;;  %v2706_v0 = vmov 0.0   ;;  %vm2707_vm0 = vmmov 0   ;;  %v2422_v1 = vld [vmem:[#allocation2] sm:$0xff]  }
  0xa7   : > { %s1938_s16 = sshll.u32 %s3336_s30, 2  ;;  %2136 = vmatprep.subr.bf16.mxu1 %v2706_v0  ;;  %2138 = vmatprep.mubr.msk.bf16.mxu1 %vm2707_vm0, %v2706_v0  ;;  %vm549_vm1 = vcmask 130048   ;;  %v2424_v3 = vld [vmem:[%s3310_s3] sm:$0xff]   ;;  %v2425_v4 = vld [vmem:[%s3310_s3 + $0x8] sm:$0xff]   ;;  %v2426_v5 = vld [vmem:[%s3310_s3 + $0x10] sm:$0xff]   ;;  %v2708_v25 = vmov 0  }
  0xa8   : > { %p515_p5 = scmp.lt.s32.totalorder %s1938_s16, 7  ;;  %2162 = vmatprep.subr.bf16.mxu0 %v2706_v0  ;;  %2178 = vmatprep.mubr.msk.bf16.mxu0 %vm2707_vm0, %v2706_v0  ;;  %v2427_v6 = vld [vmem:[%s3310_s3 + $0x18] sm:$0xff]   ;;  %v2428_v7 = vld [vmem:[%s3310_s3 + $0x20] sm:$0xff]   ;;  %v2429_v8 = vld [vmem:[%s3310_s3 + $0x28] sm:$0xff]   ;;  %s3337_s22 = sld [smem:[#allocation17_spill]]  ;;  %vm1164_vm2 = vcmask 31744  }
  0xa9   : > { %2137 = vmatpush3.bf16.msra.mxu1 %v2422_v1  ;;  %v2430_v9 = vld [vmem:[%s3310_s3 + $0x30] sm:$0xff]   ;;  %v2431_v10 = vld [vmem:[%s3310_s3 + $0x38] sm:$0xff]   ;;  %v2435_v14 = vld [vmem:[#allocation7 + $0x18] sm:$0xff]  }
  0xaa   : > { %s3339_s16 = smov (!%p515_p5, %s1938_s16), 7  ;;  %2142 = vmatprep.subr.bf16.mxu1 %v2706_v0  ;;  %v2432_v11 = vld [vmem:[#allocation7] sm:$0xff]   ;;  %v2433_v12 = vld [vmem:[#allocation7 + $0x8] sm:$0xff]   ;;  %v2434_v13 = vld [vmem:[#allocation7 + $0x10] sm:$0xff]  }
  0xab   : > { %s1939_s29 = sshll.u32 %s3339_s16, 2  ;;  %2163 = vmatpush3.bf16.msra.mxu0 %v2432_v11  ;;  %v2436_v15 = vld [vmem:[#allocation7 + $0x20] sm:$0xff]   ;;  %v2437_v16 = vld [vmem:[#allocation7 + $0x28] sm:$0xff]   ;;  %v3030_v17 = vld [vmem:[#allocation4] ss:$0 sm:$0xff]  ;;  %s1941_s14 = sshll.u32 %s3339_s16, 3 }
  0xac   : > { %s2985_s19 = scalar_lea.vmem %s3307_s0, %s1939_s29  ;;  %2164 = vmatprep.subr.bf16.mxu0 %v2706_v0  ;;  %v2438_v27 = vld [vmem:[#allocation7 + $0x30] sm:$0xff]   ;;  %v2439_v28 = vld [vmem:[#allocation7 + $0x38] sm:$0xff]   ;;  %v2442_v31 = vld [vmem:[%s3314_s7 + $0x10] sm:$0xff]  }
  0xad   : > { %v2423_v2 = vld [vmem:[%s2985_s19] sm:$0xff]   ;;  %v2441_v30 = vld [vmem:[%s3314_s7 + $0x8] sm:$0xff]   ;;  %v2443_v32 = vld [vmem:[%s3314_s7 + $0x18] sm:$0xff]  }
  0xae   : > { %2139 = vmatmul.mubr.msk.bf16.vlgmr.msra.gmra.mrb[0].mxu1 %vm549_vm1, %v2423_v2  ;;  %v2440_v29 = vld [vmem:[%s3314_s7] sm:$0xff]   ;;  %v2445_v34 = vld [vmem:[%s3314_s7 + $0x28] sm:$0xff]   ;;  %v2446_v44 = vld [vmem:[%s3314_s7 + $0x30] sm:$0xff]  }
  0xaf   : > { %2143 = vmatpush3.bf16.msra.mxu1 %v2424_v3  ;;  %2158 = vmatprep.mubr.msk.bf16.mxu1 %vm2707_vm0, %v2706_v0  ;;  %v2444_v33 = vld [vmem:[%s3314_s7 + $0x20] sm:$0xff]   ;;  %v3063_v35 = vld [vmem:[#allocation6] ss:$0 sm:$0xff]  ;;  %v2447_v45 = vld [vmem:[%s3314_s7 + $0x38] sm:$0xff]  }
  0xb0   : > { %2144 = vmatprep.subr.bf16.mxu1 %v2706_v0  ;;  %2165 = vmatpush3.bf16.msra.mxu0 %v2433_v12  ;;  %v2448_v46 = vld [vmem:[#allocation10] sm:$0xff]   ;;  %v2449_v47 = vld [vmem:[#allocation10 + $0x8] sm:$0xff]   ;;  %v2450_v48 = vld [vmem:[#allocation10 + $0x10] sm:$0xff]  }
  0xb1   : > { %2166 = vmatprep.subr.bf16.mxu0 %v2706_v0  ;;  %v2451_v49 = vld [vmem:[#allocation10 + $0x18] sm:$0xff]   ;;  %v2452_v50 = vld [vmem:[#allocation10 + $0x20] sm:$0xff]   ;;  %v2453_v51 = vld [vmem:[#allocation10 + $0x28] sm:$0xff]  }
  0xb2   : > { %v3084_v52 = vld [vmem:[#allocation9] ss:$0 sm:$0xff]  ;;  %v2454_v61 = vld [vmem:[#allocation10 + $0x30] sm:$0xff]   ;;  %v2460_v2 = vld [vmem:[%s3318_s11 + $0x10] sm:$0xff]  }
  0xb3   : > { %2145 = vmatpush3.bf16.msra.mxu1 %v2425_v4  ;;  %v2455_v62 = vld [vmem:[#allocation10 + $0x38] sm:$0xff]   ;;  %v2462_v3 = vld [vmem:[%s3318_s11 + $0x18] sm:$0xff]  }
  0xb4   : > { %2146 = vmatprep.subr.bf16.mxu1 %v2706_v0  ;;  %2167 = vmatpush3.bf16.msra.mxu0 %v2434_v13  ;;  %v2458_v63 = vld [vmem:[%s3318_s11] sm:$0xff]   ;;  %v2459_v1 = vld [vmem:[%s3318_s11 + $0x8] sm:$0xff]  }
  0xb5   : > { %2168 = vmatprep.subr.bf16.mxu0 %v2706_v0  ;;  %v2464_v4 = vld [vmem:[%s3318_s11 + $0x20] sm:$0xff]  }
  0xb7   : > { %2147 = vmatpush3.bf16.msra.mxu1 %v2426_v5  ;;  %v2466_v5 = vld [vmem:[%s3318_s11 + $0x28] sm:$0xff]  }
  0xb8   : > { %2148 = vmatprep.subr.bf16.mxu1 %v2706_v0  ;;  %2169 = vmatpush3.bf16.msra.mxu0 %v2435_v14  ;;  %v2456_v14 = vld [vmem:[#allocation2] sm:$0xff]  }
  0xb9   : > { %2170 = vmatprep.subr.bf16.mxu0 %v2706_v0 }
  0xbb   : > { %2149 = vmatpush3.bf16.msra.mxu1 %v2427_v6  ;;  %v3120_v6 = vld [vmem:[%s3315_s8] ss:$0 sm:$0xff] }
  0xbc   : > { %2150 = vmatprep.subr.bf16.mxu1 %v2706_v0  ;;  %2171 = vmatpush3.bf16.msra.mxu0 %v2436_v15 }
  0xbd   : > { %2172 = vmatprep.subr.bf16.mxu0 %v2706_v0 }
  0xbf   : > { %2151 = vmatpush3.bf16.msra.mxu1 %v2428_v7 }
  0xc0   : > { %2152 = vmatprep.subr.bf16.mxu1 %v2706_v0  ;;  %2173 = vmatpush3.bf16.msra.mxu0 %v2437_v16  ;;  %v2457_v16 = vld [vmem:[%s2985_s19 + $0x8] sm:$0xff]   ;;  %s3228_s19 = scalar_lea.vmem %s3337_s22, %s1941_s14 }
  0xc1   : > { %2174 = vmatprep.subr.bf16.mxu0 %v2706_v0 }
  0xc3   : > { %2153 = vmatpush3.bf16.msra.mxu1 %v2429_v8 }
  0xc4   : > { %2154 = vmatprep.subr.bf16.mxu1 %v2706_v0  ;;  %2175 = vmatpush3.bf16.msra.mxu0 %v2438_v27  ;;  %v2472_v27 = vld [vmem:[%s3310_s3 + $0x30] sm:$0xff]  }
  0xc5   : > { %2176 = vmatprep.subr.bf16.mxu0 %v2706_v0 }
  0xc7   : > { %2155 = vmatpush3.bf16.msra.mxu1 %v2430_v9 }
  0xc8   : > { %2156 = vmatprep.subr.bf16.mxu1 %v2706_v0  ;;  %2177 = vmatpush3.bf16.msra.mxu0 %v2439_v28  ;;  %v2473_v28 = vld [vmem:[%s3310_s3 + $0x38] sm:$0xff]  }
  0xc9   : > { %2202 = vmatprep.subr.bf16.mxu0 %v2706_v0 }
  0xcb   : > { %2157 = vmatpush3.bf16.msra.mxu1 %v2431_v10 }
  0xcc   : > { %2182 = vmatprep.subr.bf16.mxu1 %v2706_v0 }
 0x181   : > { %v587_v18 = vpop.f32.mrb[0].mxu1 }
 0x182   : > { %v2140_v19 = vpop.f32.mrb[1].mxu1  ;;  %v588_v21 = vadd.f32 %v3030_v17, %v587_v18  ;;  %v2461_v18 = vld [vmem:[%s3310_s3] sm:$0xff]  }
 0x183   : > { %v590_v20 = vpop.f32.mrb[2].mxu1  ;;  %v2463_v19 = vld [vmem:[%s3310_s3 + $0x8] sm:$0xff]  }
 0x184   : > { %v591_v22 = vadd.f32 %v3030_v17, %v590_v20  ;;  %v2141_v23 = vpop.f32.mrb[3].mxu1  ;;  %v2465_v20 = vld [vmem:[%s3310_s3 + $0x10] sm:$0xff]  }
 0x185   : > { %v2469_v23 = vld [vmem:[%s3310_s3 + $0x20] sm:$0xff]  }
 0x186   : > { %v594_v24 = vpack.c.bf16 %v591_v22, %v588_v21  ;;  %v2467_v21 = vld [vmem:[%s3310_s3 + $0x18] sm:$0xff]   ;;  %v2468_v22 = vld [vmem:[%s3318_s11 + $0x30] sm:$0xff]  }
 0x188   : > { %v595_v26 = vmax.bf16 %v2708_v25, %v594_v24  ;;  %v2470_v24 = vld [vmem:[%s3318_s11 + $0x38] sm:$0xff]  }
 0x18a   : > { %2159 = vmatmul.mubr.bf16.vlgmr.msra.gmra.mrb[4].mxu1 %v595_v26  ;;  %v2471_v26 = vld [vmem:[%s3310_s3 + $0x28] sm:$0xff]  }
 0x18b   : > { %2198 = vmatprep.mubr.msk.bf16.mxu1 %vm2707_vm0, %v2706_v0  ;;  %2183 = vmatpush3.bf16.msra.mxu1 %v2440_v29  ;;  %v3175_v29 = vld [vmem:[%s3317_s10] ss:$0 sm:$0xff] }
 0x18c   : > { %2184 = vmatprep.subr.bf16.mxu1 %v2706_v0 }
 0x18f   : > { %2185 = vmatpush3.bf16.msra.mxu1 %v2441_v30 }
 0x190   : > { %2186 = vmatprep.subr.bf16.mxu1 %v2706_v0 }
 0x193   : > { %2187 = vmatpush3.bf16.msra.mxu1 %v2442_v31 }
 0x194   : > { %2188 = vmatprep.subr.bf16.mxu1 %v2706_v0 }
 0x197   : > { %2189 = vmatpush3.bf16.msra.mxu1 %v2443_v32 }
 0x198   : > { %2190 = vmatprep.subr.bf16.mxu1 %v2706_v0 }
 0x19b   : > { %2191 = vmatpush3.bf16.msra.mxu1 %v2444_v33 }
 0x19c   : > { %2192 = vmatprep.subr.bf16.mxu1 %v2706_v0 }
 0x19f   : > { %2193 = vmatpush3.bf16.msra.mxu1 %v2445_v34 }
 0x1a0   : > { %2194 = vmatprep.subr.bf16.mxu1 %v2706_v0 }
 0x1a3   : > { %2195 = vmatpush3.bf16.msra.mxu1 %v2446_v44 }
 0x1a4   : > { %2196 = vmatprep.subr.bf16.mxu1 %v2706_v0 }
 0x1a7   : > { %2197 = vmatpush3.bf16.msra.mxu1 %v2447_v45 }
 0x1a8   : > { %2222 = vmatprep.subr.bf16.mxu1 %v2706_v0 }
 0x25d   : > { %v701_v36 = vpop.f32.mrb[4].mxu1 }
 0x25e   : > { %v2160_v37 = vpop.f32.mrb[5].mxu1  ;;  %v702_v39 = vadd.f32 %v3063_v35, %v701_v36 }
 0x25f   : > { %v704_v38 = vpop.f32.mrb[6].mxu1 }
 0x260   : > { %v705_v40 = vadd.f32 %v3063_v35, %v704_v38  ;;  %v2161_v41 = vpop.f32.mrb[7].mxu1  ;;  %v2474_v38 = vld [vmem:[#allocation7] sm:$0xff]  }
 0x262   : > { %v708_v42 = vpack.c.bf16 %v705_v40, %v702_v39 }
 0x264   : > { %v709_v43 = vmax.bf16 %v2708_v25, %v708_v42 }
 0x266   : > { %2179 = vmatmul.mubr.bf16.vlgmr.msra.gmra.mrb[0].mxu0 %v709_v43  ;;  %v2475_v43 = vld [vmem:[#allocation7 + $0x8] sm:$0xff]  }
 0x267   : > { %2218 = vmatprep.mubr.msk.bf16.mxu0 %vm2707_vm0, %v2706_v0  ;;  %2203 = vmatpush3.bf16.msra.mxu0 %v2448_v46 }
 0x268   : > { %2204 = vmatprep.subr.bf16.mxu0 %v2706_v0 }
 0x26b   : > { %2205 = vmatpush3.bf16.msra.mxu0 %v2449_v47 }
 0x26c   : > { %2206 = vmatprep.subr.bf16.mxu0 %v2706_v0 }
 0x26f   : > { %2207 = vmatpush3.bf16.msra.mxu0 %v2450_v48  ;;  %v2476_v48 = vld [vmem:[#allocation7 + $0x10] sm:$0xff]  }
 0x270   : > { %2208 = vmatprep.subr.bf16.mxu0 %v2706_v0 }
 0x273   : > { %2209 = vmatpush3.bf16.msra.mxu0 %v2451_v49 }
 0x274   : > { %2210 = vmatprep.subr.bf16.mxu0 %v2706_v0 }
 0x277   : > { %2211 = vmatpush3.bf16.msra.mxu0 %v2452_v50  ;;  %v2477_v50 = vld [vmem:[#allocation7 + $0x18] sm:$0xff]  }
 0x278   : > { %2212 = vmatprep.subr.bf16.mxu0 %v2706_v0 }
 0x27b   : > { %2213 = vmatpush3.bf16.msra.mxu0 %v2453_v51  ;;  %v2479_v51 = vld [vmem:[#allocation7 + $0x28] sm:$0xff]  }
 0x27c   : > { %2214 = vmatprep.subr.bf16.mxu0 %v2706_v0 }
 0x27f   : > { %2215 = vmatpush3.bf16.msra.mxu0 %v2454_v61  ;;  %v3223_v61 = vld [vmem:[%s3319_s12] ss:$0 sm:$0xff] }
 0x280   : > { %2216 = vmatprep.subr.bf16.mxu0 %v2706_v0 }
 0x283   : > { %2217 = vmatpush3.bf16.msra.mxu0 %v2455_v62 }
 0x284   : > { %2242 = vmatprep.subr.bf16.mxu0 %v2706_v0 }
 0x339   : > { %v815_v53 = vpop.f32.mrb[0].mxu0 }
 0x33a   : > { %v2180_v54 = vpop.f32.mrb[1].mxu0  ;;  %v816_v56 = vadd.f32 %v3084_v52, %v815_v53  ;;  %v2480_v53 = vld [vmem:[#allocation7 + $0x30] sm:$0xff]  }
 0x33b   : > { %v818_v55 = vpop.f32.mrb[2].mxu0  ;;  %v2481_v54 = vld [vmem:[#allocation7 + $0x38] sm:$0xff]  }
 0x33c   : > { %v819_v57 = vadd.f32 %v3084_v52, %v818_v55  ;;  %v2181_v58 = vpop.f32.mrb[3].mxu0  ;;  %v2482_v55 = vld [vmem:[%s3314_s7] sm:$0xff]  }
 0x33d   : > { %v2485_v58 = vld [vmem:[%s3314_s7 + $0x18] sm:$0xff]  }
 0x33e   : > { %v822_v59 = vpack.c.bf16 %v819_v57, %v816_v56  ;;  %v2483_v56 = vld [vmem:[%s3314_s7 + $0x8] sm:$0xff]   ;;  %v2484_v57 = vld [vmem:[%s3314_s7 + $0x10] sm:$0xff]  }
 0x340   : > { %v823_v60 = vmax.bf16 %v2708_v25, %v822_v59  ;;  %v2486_v59 = vld [vmem:[%s3314_s7 + $0x20] sm:$0xff]  }
 0x342   : > { %2199 = vmatmul.mubr.bf16.vlgmr.msra.gmra.mrb[8].mxu1 %v823_v60  ;;  %v2487_v60 = vld [vmem:[%s3314_s7 + $0x28] sm:$0xff]  }
 0x343   : > { %2238 = vmatprep.mubr.msk.bf16.mxu1 %vm2707_vm0, %v2706_v0  ;;  %2223 = vmatpush3.bf16.msra.mxu1 %v2458_v63 }
 0x344   : > { %2224 = vmatprep.subr.bf16.mxu1 %v2706_v0 }
 0x347   : > { %2225 = vmatpush3.bf16.msra.mxu1 %v2459_v1 }
 0x348   : > { %2226 = vmatprep.subr.bf16.mxu1 %v2706_v0 }
 0x34b   : > { %2227 = vmatpush3.bf16.msra.mxu1 %v2460_v2 }
 0x34c   : > { %2228 = vmatprep.subr.bf16.mxu1 %v2706_v0 }
 0x34f   : > { %2229 = vmatpush3.bf16.msra.mxu1 %v2462_v3 }
 0x350   : > { %2230 = vmatprep.subr.bf16.mxu1 %v2706_v0 }
 0x353   : > { %2231 = vmatpush3.bf16.msra.mxu1 %v2464_v4 }
 0x354   : > { %2232 = vmatprep.subr.bf16.mxu1 %v2706_v0 }
 0x357   : > { %2233 = vmatpush3.bf16.msra.mxu1 %v2466_v5 }
 0x358   : > { %2234 = vmatprep.subr.bf16.mxu1 %v2706_v0 }
 0x35b   : > { %2235 = vmatpush3.bf16.msra.mxu1 %v2468_v22 }
 0x35c   : > { %2236 = vmatprep.subr.bf16.mxu1 %v2706_v0 }
 0x35f   : > { %2237 = vmatpush3.bf16.msra.mxu1 %v2470_v24 }
 0x360   : > { %2268 = vmatprep.subr.bf16.mxu1 %v2706_v0 }
 0x415   : > { %v929_v7 = vpop.f32.mrb[8].mxu1 }
 0x416   : > { %v2200_v8 = vpop.f32.mrb[9].mxu1  ;;  %v930_v10 = vadd.f32 %v3120_v6, %v929_v7 }
 0x417   : > { %v932_v9 = vpop.f32.mrb[10].mxu1 }
 0x418   : > { %v933_v11 = vadd.f32 %v3120_v6, %v932_v9  ;;  %v2201_v12 = vpop.f32.mrb[11].mxu1 }
 0x41a   : > { %v936_v13 = vpack.c.bf16 %v933_v11, %v930_v10 }
 0x41c   : > { %v937_v15 = vmax.bf16 %v2708_v25, %v936_v13 }
 0x41e   : > { %2219 = vmatmul.mubr.bf16.vlgmr.msra.gmra.mrb[4].mxu0 %v937_v15  ;;  %v2489_v15 = vld [vmem:[%s3314_s7 + $0x38] sm:$0xff]  }
 0x41f   : > { %2243 = vmatpush3.bf16.msra.mxu0 %v2456_v14  ;;  %2244 = vmatprep.mubr.msk.bf16.mxu0 %vm2707_vm0, %v2706_v0  ;;  %v2488_v14 = vld [vmem:[%s3314_s7 + $0x30] sm:$0xff]  }
 0x420   : > { %2248 = vmatprep.subr.bf16.mxu0 %v2706_v0 }
 0x426   : > { %2245 = vmatmul.mubr.msk.bf16.vlgmr.msra.gmra.mrb[8].mxu0 %vm549_vm1, %v2457_v16  ;;  %v2491_v16 = vld [vmem:[#allocation10 + $0x8] sm:$0xff]  }
 0x427   : > { %2249 = vmatpush3.bf16.msra.mxu0 %v2461_v18  ;;  %2264 = vmatprep.mubr.msk.bf16.mxu0 %vm2707_vm0, %v2706_v0  ;;  %v2492_v18 = vld [vmem:[#allocation10 + $0x10] sm:$0xff]  }
 0x428   : > { %2250 = vmatprep.subr.bf16.mxu0 %v2706_v0 }
 0x42b   : > { %2251 = vmatpush3.bf16.msra.mxu0 %v2463_v19  ;;  %v2493_v19 = vld [vmem:[#allocation10 + $0x18] sm:$0xff]  }
 0x42c   : > { %2252 = vmatprep.subr.bf16.mxu0 %v2706_v0 }
 0x42f   : > { %2253 = vmatpush3.bf16.msra.mxu0 %v2465_v20  ;;  %v2494_v20 = vld [vmem:[#allocation10 + $0x20] sm:$0xff]  }
 0x430   : > { %2254 = vmatprep.subr.bf16.mxu0 %v2706_v0 }
 0x433   : > { %2255 = vmatpush3.bf16.msra.mxu0 %v2467_v21  ;;  %v2495_v21 = vld [vmem:[#allocation10 + $0x28] sm:$0xff]  }
 0x434   : > { %2256 = vmatprep.subr.bf16.mxu0 %v2706_v0 }
 0x437   : > { %2257 = vmatpush3.bf16.msra.mxu0 %v2469_v23 }
 0x438   : > { %2258 = vmatprep.subr.bf16.mxu0 %v2706_v0 }
 0x43b   : > { %2259 = vmatpush3.bf16.msra.mxu0 %v2471_v26 }
 0x43c   : > { %2260 = vmatprep.subr.bf16.mxu0 %v2706_v0 }
 0x43f   : > { %2261 = vmatpush3.bf16.msra.mxu0 %v2472_v27 }
 0x440   : > { %2262 = vmatprep.subr.bf16.mxu0 %v2706_v0 }
 0x443   : > { %2263 = vmatpush3.bf16.msra.mxu0 %v2473_v28 }
 0x444   : > { %2288 = vmatprep.subr.bf16.mxu0 %v2706_v0 }
 0x4f1   : > { %v1043_v30 = vpop.f32.mrb[4].mxu0 }
 0x4f2   : > { %v2220_v31 = vpop.f32.mrb[5].mxu0  ;;  %v1044_v33 = vadd.f32 %v3175_v29, %v1043_v30 }
 0x4f3   : > { %v1046_v32 = vpop.f32.mrb[6].mxu0 }
 0x4f4   : > { %v1047_v34 = vadd.f32 %v3175_v29, %v1046_v32  ;;  %v2221_v36 = vpop.f32.mrb[7].mxu0  ;;  %v2496_v32 = vld [vmem:[#allocation10 + $0x30] sm:$0xff]  }
 0x4f5   : > { %v2500_v36 = vld [vmem:[%s3318_s11 + $0x10] sm:$0xff]  }
 0x4f6   : > { %v1050_v37 = vpack.c.bf16 %v1047_v34, %v1044_v33  ;;  %v2497_v33 = vld [vmem:[#allocation10 + $0x38] sm:$0xff]  }
 0x4f7   : > { %v2498_v34 = vld [vmem:[%s3318_s11] sm:$0xff]  }
 0x4f8   : > { %v1051_v39 = vmax.bf16 %v2708_v25, %v1050_v37  ;;  %v2501_v37 = vld [vmem:[%s3318_s11 + $0x18] sm:$0xff]  }
 0x4f9   : > { %v1226_v40 = vpop.f32.mrb[8].mxu0 }
 0x4fa   : > { %2239 = vmatmul.mubr.bf16.vlgmr.msra.gmra.mrb[12].mxu1 %v1051_v39  ;;  %v2246_v41 = vpop.f32.mrb[9].mxu0  ;;  %v1227_v44 = vadd.f32 %v3030_v17, %v1226_v40  ;;  %v2503_v39 = vld [vmem:[%s3318_s11 + $0x28] sm:$0xff]  }
 0x4fb   : > { %v1229_v42 = vpop.f32.mrb[10].mxu0  ;;  %2269 = vmatpush3.bf16.msra.mxu1 %v2474_v38  ;;  %2284 = vmatprep.mubr.msk.bf16.mxu1 %vm2707_vm0, %v2706_v0  ;;  %v2502_v38 = vld [vmem:[%s3318_s11 + $0x20] sm:$0xff]  }
 0x4fc   : > { %v1230_v45 = vadd.f32 %v3030_v17, %v1229_v42  ;;  %v2247_v46 = vpop.f32.mrb[11].mxu0  ;;  %2270 = vmatprep.subr.bf16.mxu1 %v2706_v0  ;;  %v2478_v17 = vld [vmem:[#allocation7 + $0x20] sm:$0xff]  }
 0x4fe   : > { %v1233_v47 = vpack.c.bf16 %v1230_v45, %v1227_v44 }
 0x4ff   : > { %2271 = vmatpush3.bf16.msra.mxu1 %v2475_v43 }
 0x500   : > { %v1234_v49 = vmax.bf16 %v2708_v25, %v1233_v47  ;;  %2272 = vmatprep.subr.bf16.mxu1 %v2706_v0 }
 0x502   : > { %2265 = vmatmul.mubr.bf16.vlgmr.msra.gmra.mrb[12].mxu0 %v1234_v49  ;;  %v2505_v49 = vld [vmem:[%s3318_s11 + $0x38] sm:$0xff]  }
 0x503   : > { %2273 = vmatpush3.bf16.msra.mxu1 %v2476_v48  ;;  %2304 = vmatprep.mubr.msk.bf16.mxu0 %vm2707_vm0, %v2706_v0  ;;  %v2504_v48 = vld [vmem:[%s3318_s11 + $0x30] sm:$0xff]  }
 0x504   : > { %2274 = vmatprep.subr.bf16.mxu1 %v2706_v0  ;;  %2289 = vmatpush3.bf16.msra.mxu0 %v2482_v55 }
 0x505   : > { %2290 = vmatprep.subr.bf16.mxu0 %v2706_v0 }
 0x507   : > { %2275 = vmatpush3.bf16.msra.mxu1 %v2477_v50 }
 0x508   : > { %2276 = vmatprep.subr.bf16.mxu1 %v2706_v0  ;;  %2291 = vmatpush3.bf16.msra.mxu0 %v2483_v56 }
 0x509   : > { %2292 = vmatprep.subr.bf16.mxu0 %v2706_v0 }
 0x50b   : > { %2277 = vmatpush3.bf16.msra.mxu1 %v2478_v17 }
 0x50c   : > { %2278 = vmatprep.subr.bf16.mxu1 %v2706_v0  ;;  %2293 = vmatpush3.bf16.msra.mxu0 %v2484_v57 }
 0x50d   : > { %2294 = vmatprep.subr.bf16.mxu0 %v2706_v0 }
 0x50f   : > { %2279 = vmatpush3.bf16.msra.mxu1 %v2479_v51 }
 0x510   : > { %2280 = vmatprep.subr.bf16.mxu1 %v2706_v0  ;;  %2295 = vmatpush3.bf16.msra.mxu0 %v2485_v58 }
 0x511   : > { %2296 = vmatprep.subr.bf16.mxu0 %v2706_v0 }
 0x513   : > { %2281 = vmatpush3.bf16.msra.mxu1 %v2480_v53 }
 0x514   : > { %2282 = vmatprep.subr.bf16.mxu1 %v2706_v0  ;;  %2297 = vmatpush3.bf16.msra.mxu0 %v2486_v59 }
 0x515   : > { %2298 = vmatprep.subr.bf16.mxu0 %v2706_v0 }
 0x517   : > { %2283 = vmatpush3.bf16.msra.mxu1 %v2481_v54 }
 0x518   : > { %2308 = vmatprep.subr.bf16.mxu1 %v2706_v0  ;;  %2299 = vmatpush3.bf16.msra.mxu0 %v2487_v60 }
 0x519   : > { %2300 = vmatprep.subr.bf16.mxu0 %v2706_v0 }
 0x51c   : > { %2301 = vmatpush3.bf16.msra.mxu0 %v2488_v14 }
 0x51d   : > { %2302 = vmatprep.subr.bf16.mxu0 %v2706_v0 }
 0x520   : > { %2303 = vmatpush3.bf16.msra.mxu0 %v2489_v15 }
 0x521   : > { %2328 = vmatprep.subr.bf16.mxu0 %v2706_v0 }
 0x5cd   : > { %v1157_v62 = vpop.f32.mrb[12].mxu1 }
 0x5ce   : > { %v1158_v63 = vadd.f32 %v3223_v61, %v1157_v62  ;;  %v2240_v1 = vpop.f32.mrb[13].mxu1 }
 0x5cf   : > { %v1160_v2 = vpop.f32.mrb[14].mxu1 }
 0x5d0   : > { %1165 = vst.msk [vmem:[%s3228_s19] sm:$0xff] %vm1164_vm2, %v1158_v63  ;;  %v1161_v3 = vadd.f32 %v3223_v61, %v1160_v2  ;;  %v2241_v4 = vpop.f32.mrb[15].mxu1 }
 0x5d2   : > { %1166 = vst.msk [vmem:[%s3228_s19 + $0x8] sm:$0xff] %vm1164_vm2, %v1161_v3 }
 0x5d5   : > { %v1340_v5 = vpop.f32.mrb[12].mxu0 }
 0x5d6   : > { %v2266_v7 = vpop.f32.mrb[13].mxu0  ;;  %v1341_v9 = vadd.f32 %v3063_v35, %v1340_v5 }
 0x5d7   : > { %v1343_v8 = vpop.f32.mrb[14].mxu0 }
 0x5d8   : > { %v1344_v10 = vadd.f32 %v3063_v35, %v1343_v8  ;;  %v2267_v11 = vpop.f32.mrb[15].mxu0  ;;  %v2490_v35 = vld [vmem:[#allocation10] sm:$0xff]  }
 0x5da   : > { %v1347_v12 = vpack.c.bf16 %v1344_v10, %v1341_v9 }
 0x5dc   : > { %v1348_v13 = vmax.bf16 %v2708_v25, %v1347_v12 }
 0x5de   : > { %2285 = vmatmul.mubr.bf16.vlgmr.msra.gmra.mrb[16].mxu1 %v1348_v13 }
 0x5df   : > { %2324 = vmatprep.mubr.msk.bf16.mxu1 %vm2707_vm0, %v2706_v0  ;;  %2309 = vmatpush3.bf16.msra.mxu1 %v2490_v35 }
 0x5e0   : > { %2310 = vmatprep.subr.bf16.mxu1 %v2706_v0 }
 0x5e3   : > { %2311 = vmatpush3.bf16.msra.mxu1 %v2491_v16 }
 0x5e4   : > { %2312 = vmatprep.subr.bf16.mxu1 %v2706_v0 }
 0x5e7   : > { %2313 = vmatpush3.bf16.msra.mxu1 %v2492_v18 }
 0x5e8   : > { %2314 = vmatprep.subr.bf16.mxu1 %v2706_v0 }
 0x5eb   : > { %2315 = vmatpush3.bf16.msra.mxu1 %v2493_v19 }
 0x5ec   : > { %2316 = vmatprep.subr.bf16.mxu1 %v2706_v0 }
 0x5ef   : > { %2317 = vmatpush3.bf16.msra.mxu1 %v2494_v20 }
 0x5f0   : > { %2318 = vmatprep.subr.bf16.mxu1 %v2706_v0 }
 0x5f3   : > { %2319 = vmatpush3.bf16.msra.mxu1 %v2495_v21 }
 0x5f4   : > { %2320 = vmatprep.subr.bf16.mxu1 %v2706_v0 }
 0x5f7   : > { %2321 = vmatpush3.bf16.msra.mxu1 %v2496_v32 }
 0x5f8   : > { %2322 = vmatprep.subr.bf16.mxu1 %v2706_v0 }
 0x5fb   : > { %2323 = vmatpush3.bf16.msra.mxu1 %v2497_v33 }
 0x6b1   : > { %v1454_v22 = vpop.f32.mrb[16].mxu1 }
 0x6b2   : > { %v2286_v23 = vpop.f32.mrb[17].mxu1  ;;  %v1455_v26 = vadd.f32 %v3084_v52, %v1454_v22 }
 0x6b3   : > { %v1457_v24 = vpop.f32.mrb[18].mxu1 }
 0x6b4   : > { %v1458_v27 = vadd.f32 %v3084_v52, %v1457_v24  ;;  %v2287_v28 = vpop.f32.mrb[19].mxu1  ;;  %v2499_v52 = vld [vmem:[%s3318_s11 + $0x8] sm:$0xff]  }
 0x6b6   : > { %v1461_v30 = vpack.c.bf16 %v1458_v27, %v1455_v26 }
 0x6b8   : > { %v1462_v31 = vmax.bf16 %v2708_v25, %v1461_v30 }
 0x6ba   : > { %2305 = vmatmul.mubr.bf16.vlgmr.msra.gmra.mrb[16].mxu0 %v1462_v31 }
 0x6bb   : > { %2344 = vmatprep.mubr.msk.bf16.mxu0 %vm2707_vm0, %v2706_v0  ;;  %2329 = vmatpush3.bf16.msra.mxu0 %v2498_v34 }
 0x6bc   : > { %2330 = vmatprep.subr.bf16.mxu0 %v2706_v0 }
 0x6bf   : > { %2331 = vmatpush3.bf16.msra.mxu0 %v2499_v52 }
 0x6c0   : > { %2332 = vmatprep.subr.bf16.mxu0 %v2706_v0 }
 0x6c3   : > { %2333 = vmatpush3.bf16.msra.mxu0 %v2500_v36 }
 0x6c4   : > { %2334 = vmatprep.subr.bf16.mxu0 %v2706_v0 }
 0x6c7   : > { %2335 = vmatpush3.bf16.msra.mxu0 %v2501_v37 }
 0x6c8   : > { %2336 = vmatprep.subr.bf16.mxu0 %v2706_v0 }
 0x6cb   : > { %2337 = vmatpush3.bf16.msra.mxu0 %v2502_v38 }
 0x6cc   : > { %2338 = vmatprep.subr.bf16.mxu0 %v2706_v0 }
 0x6cf   : > { %2339 = vmatpush3.bf16.msra.mxu0 %v2503_v39 }
 0x6d0   : > { %2340 = vmatprep.subr.bf16.mxu0 %v2706_v0 }
 0x6d3   : > { %2341 = vmatpush3.bf16.msra.mxu0 %v2504_v48 }
 0x6d4   : > { %2342 = vmatprep.subr.bf16.mxu0 %v2706_v0 }
 0x6d7   : > { %2343 = vmatpush3.bf16.msra.mxu0 %v2505_v49 }
 0x78d   : > { %v1568_v40 = vpop.f32.mrb[16].mxu0 }
 0x78e   : > { %v2306_v41 = vpop.f32.mrb[17].mxu0  ;;  %v1569_v43 = vadd.f32 %v3120_v6, %v1568_v40 }
 0x78f   : > { %v1571_v42 = vpop.f32.mrb[18].mxu0 }
 0x790   : > { %v1572_v44 = vadd.f32 %v3120_v6, %v1571_v42  ;;  %v2307_v45 = vpop.f32.mrb[19].mxu0 }
 0x792   : > { %v1575_v46 = vpack.c.bf16 %v1572_v44, %v1569_v43 }
 0x794   : > { %v1576_v47 = vmax.bf16 %v2708_v25, %v1575_v46 }
 0x796   : > { %2325 = vmatmul.mubr.bf16.vlgmr.msra.gmra.mrb[20].mxu1 %v1576_v47 }
 0x869   : > { %v1682_v50 = vpop.f32.mrb[20].mxu1 }
 0x86a   : > { %v2326_v6 = vpop.f32.mrb[21].mxu1  ;;  %v1683_v51 = vadd.f32 %v3175_v29, %v1682_v50 }
 0x86b   : > { %v1685_v17 = vpop.f32.mrb[22].mxu1 }
 0x86c   : > { %v1686_v53 = vadd.f32 %v3175_v29, %v1685_v17  ;;  %v2327_v54 = vpop.f32.mrb[23].mxu1 }
 0x86e   : > { %v1689_v55 = vpack.c.bf16 %v1686_v53, %v1683_v51 }
 0x870   : > { %v1690_v56 = vmax.bf16 %v2708_v25, %v1689_v55 }
 0x872   : > { %2345 = vmatmul.mubr.bf16.vlgmr.msra.gmra.mrb[20].mxu0 %v1690_v56 }
 0x945   : > { %v1796_v0 = vpop.f32.mrb[20].mxu0 }
 0x946   : > { %v1797_v57 = vadd.f32 %v3223_v61, %v1796_v0  ;;  %v2346_v58 = vpop.f32.mrb[21].mxu0 }
 0x947   : > { %v1799_v59 = vpop.f32.mrb[22].mxu0 }
 0x948   : > { %1803 = vst.msk [vmem:[%s3228_s19 + $0x10] sm:$0xff] %vm1164_vm2, %v1797_v57  ;;  %v1800_v60 = vadd.f32 %v3223_v61, %v1799_v59  ;;  %v2347_v62 = vpop.f32.mrb[23].mxu0 }
 0x94a   : > { %1804 = vst.msk [vmem:[%s3228_s19 + $0x18] sm:$0xff] %vm1164_vm2, %v1800_v60 }
 0x94b PF: > { %s27_s25 = sadd.s32 1, %s2696_s25  }
 0x94c   : > { %p24_p3 = scmp.ge.s32.totalorder %s27_s25, 4  }
 0x94e   :  { %26 = sbr.rel (!%p24_p3) target bundleno = 7 (0x7), region = 127 }
 0x955   :  { %1827 = vsyncpa [#allocation3], 1 }
 0x956   :  { %1829 = vsyncpa [#allocation3 + $0x1], 1 }
 0x957   :  { %1830 = vsyncpa [#allocation5], 1 }
 0x958   :  { %1831 = vsyncpa [#allocation8], 1 }
 0x959   :  { %1832 = vsyncpa [#allocation11], 1 }

</bundles_post_ra>
